<compile_context>
chip_gen: v6e
topology: v6e:2x2x1
jax: 0.10.0
libtpu: 0.0.40
codegen_flags: <defaults>
</compile_context>

<pallas_src>
import functools

import jax
import jax.numpy as jnp
from jax.experimental import pallas as pl
from jax.experimental.pallas import tpu as pltpu


def _tv_kernel(x_ref, o_ref, acc_h_ref, acc_w_ref, *,
               w, nc, inv_count_h, inv_count_w, scale):
    # x_ref    : (tb, h*w) block of the folded (N*C, H*W) input, in VMEM
    # o_ref    : (1, 1, 1) per-core partial-loss output slot
    # acc_*_ref: (tb, h*w) float32 VMEM accumulators (persist across the
    #            "arbitrary" grid axis; private per core on v7x)
    tb, hw = x_ref.shape
    core = pl.program_id(0)          # "parallel" axis (2 TCs on v7x)
    j = pl.program_id(1)             # sequential reduction axis
    n_j = pl.num_programs(1)

    @pl.when(j == 0)
    def _init():
        acc_h_ref[...] = jnp.zeros_like(acc_h_ref)
        acc_w_ref[...] = jnp.zeros_like(acc_w_ref)

    # Unclamped linear block id (the index_map clamps only for the DMA).
    lin = core * n_j + j

    # Row (== image plane) validity: handles the partial last block and the
    # clamped duplicate blocks a core sees when it overshoots total_blocks.
    row_ids = jax.lax.broadcasted_iota(jnp.int32, (tb, 1), 0)
    row_valid = (lin * tb + row_ids) < nc                        # (tb, 1)

    x = jnp.where(row_valid, x_ref[...].astype(jnp.float32), 0.0)  # (tb, hw)

    # Lane-position boundary masks (built once per step on (1, hw) only, then
    # broadcast; hw >> 1 so their cost is negligible per element).
    pos = jax.lax.broadcasted_iota(jnp.int32, (1, hw), 1)
    mask_w = (pos % w) != (w - 1)        # last image column: no w-neighbour
    mask_h = pos < (hw - w)              # last image row:    no h-neighbour

    # Neighbours via XLU lane rotation (circular; wrapped lanes are masked).
    x_right = pltpu.roll(x, shift=hw - 1, axis=1)   # x[..., r, c+1] at (r, c)
    x_down = pltpu.roll(x, shift=hw - w, axis=1)    # x[..., r+1, c] at (r, c)

    dw = jnp.where(mask_w, x_right - x, 0.0)
    dh = jnp.where(mask_h, x_down - x, 0.0)

    # Element-wise accumulation: pure VALU adds per step; the expensive
    # cross-lane/sublane reduce happens only once, at finalize.
    acc_w_ref[...] += dw * dw
    acc_h_ref[...] += dh * dh

    @pl.when(j == n_j - 1)
    def _finalize():
        h_tv = jnp.sum(acc_h_ref[...], keepdims=True)    # (1, 1)
        w_tv = jnp.sum(acc_w_ref[...], keepdims=True)    # (1, 1)
        loss = scale * (h_tv * inv_count_h + w_tv * inv_count_w)
        o_ref[0] = loss.astype(o_ref.dtype)


def tv_loss(x, tv_loss_weight=1.0):
    """x: (N, C, H, W) float (f32 or bf16) -> scalar float32 TV loss."""
    n, c, h, w = x.shape
    assert h > 1 and w > 1, "TV loss needs spatial extent > 1."
    nc = n * c
    hw = h * w

    # Free (contiguous bitcast) reshape: one full image plane per row so the
    # lane axis is dense regardless of W.
    xf = x.reshape(nc, hw)

    count_h = c * (h - 1) * w
    count_w = c * h * (w - 1)
    scale = float(tv_loss_weight) * 2.0 / n

    # ---- tile / grid selection (padded-aware VMEM budget) -------------------
    itemsize = jnp.dtype(x.dtype).itemsize
    row_bytes = ((hw + 127) // 128) * 128 * itemsize     # padded lane footprint
    block_budget = 4 * 1024 * 1024                       # per input block
    tb = max(8, (block_budget // row_bytes) // 8 * 8)    # multiple of 8 rows
    tb = min(tb, ((nc + 7) // 8) * 8)                    # don't exceed the data
    total_blocks = -(-nc // tb)                          # cdiv
    # TODO(synk): for enormous planes (h*w*4 >> block_budget) add H-tiling with
    # a one-row halo; not needed for the shapes exercised here.

    num_cores = 2                        # v7x: 2 TCs; harmless (sequential) on v5e/v6e
    bpc = -(-total_blocks // num_cores)  # blocks per core

    block_bytes = tb * row_bytes
    acc_bytes = 2 * tb * ((hw + 127) // 128) * 128 * 4
    vmem_limit = max(16 * 1024 * 1024,
                     min(48 * 1024 * 1024,
                         2 * block_bytes + acc_bytes + 4 * 1024 * 1024))

    kern = functools.partial(
        _tv_kernel, w=w, nc=nc,
        inv_count_h=1.0 / count_h, inv_count_w=1.0 / count_w, scale=scale)

    def x_map(i, j):
        # Clamp so the DMA never reads past the array; duplicated / padded rows
        # are zero-masked inside the kernel.
        return (jnp.minimum(i * bpc + j, total_blocks - 1), 0)

    out = pl.pallas_call(
        kern,
        out_shape=jax.ShapeDtypeStruct((num_cores, 1, 1), jnp.float32),
        grid=(num_cores, bpc),
        in_specs=[pl.BlockSpec((tb, hw), x_map)],
        # One (1,1,1) slot per core; resident across the reduction axis and
        # written only at its finalize step.
        out_specs=pl.BlockSpec((1, 1, 1), lambda i, j: (i, 0, 0)),
        scratch_shapes=[
            pltpu.VMEM((tb, hw), jnp.float32),   # h_tv elementwise accumulator
            pltpu.VMEM((tb, hw), jnp.float32),   # w_tv elementwise accumulator
        ],
        compiler_params=pltpu.CompilerParams(
            dimension_semantics=("parallel", "arbitrary"),
            vmem_limit_bytes=vmem_limit,
        ),
    )(xf)
    # Per-core partial losses are already fully scaled; their sum is the loss.
    return jnp.sum(out)


def _reference(x, tv_loss_weight=1.0):
    n, c, h, w = x.shape
    count_h = c * (h - 1) * w
    count_w = c * h * (w - 1)
    h_tv = jnp.sum((x[:, :, 1:, :] - x[:, :, :-1, :]) ** 2)
    w_tv = jnp.sum((x[:, :, :, 1:] - x[:, :, :, :-1]) ** 2)
    return tv_loss_weight * 2.0 * (h_tv / count_h + w_tv / count_w) / n


if __name__ == "__main__":
    key = jax.random.PRNGKey(0)
    # Small input consistent with the forward: NCHW.
    x = jax.random.normal(key, (2, 4, 16, 16), dtype=jnp.float32)

    out = tv_loss(x, tv_loss_weight=1.0)
    out = jax.block_until_ready(out)

    ref = _reference(x, tv_loss_weight=1.0)
    assert out.shape == ()
    assert jnp.allclose(out, ref, atol=1e-4, rtol=1e-4), (
        f"mismatch vs reference: {out} vs {ref}")

    print("KERNEL_OK")
</pallas_src>

<mosaic_0001>
module attributes {stable_mosaic.version = 11 : i64} {
  func.func @_tv_kernel(%arg0: i32, %arg1: i32, %arg2: memref<8x256xf32, #tpu.memory_space<vmem>>, %arg3: memref<1x1x1xf32, #tpu.memory_space<vmem>>, %arg4: memref<8x256xf32, #tpu.memory_space<vmem>>, %arg5: memref<8x256xf32, #tpu.memory_space<vmem>>) attributes {dimension_semantics = [#tpu.dimension_semantics<parallel>, #tpu.dimension_semantics<arbitrary>], iteration_bounds = array<i64: 2, 1>, scalar_prefetch = 0 : i64, scratch_operands = 2 : i64, tpu.core_type = #tpu.core_type<tc>, window_params = [{transform_indices = @transform_0, window_bounds = array<i64: 8, 256>}, {transform_indices = @transform_1, window_bounds = array<i64: 1, 1, 1>}]} {
    %c0_i32 = arith.constant 0 : i32
    %0 = arith.cmpi eq, %arg1, %c0_i32 : i32
    %1 = arith.extui %0 : i1 to i32
    %c0_i32_0 = arith.constant 0 : i32
    %2 = arith.cmpi ne, %1, %c0_i32_0 : i32
    scf.if %2 {
      %cst_21 = arith.constant 0.000000e+00 : f32
      %60 = vector.broadcast %cst_21 : f32 to vector<8x256xf32>
      %c0_22 = arith.constant 0 : index
      %c0_23 = arith.constant 0 : index
      %61 = vector.load %arg4[%c0_22, %c0_23] : memref<8x256xf32, #tpu.memory_space<vmem>>, vector<8x256xf32>
      tpu.vector_store %arg4[%c0_22, %c0_23], %60 {strides = array<i32>} : memref<8x256xf32, #tpu.memory_space<vmem>>, vector<8x256xf32>,
      %cst_24 = arith.constant 0.000000e+00 : f32
      %62 = vector.broadcast %cst_24 : f32 to vector<8x256xf32>
      %c0_25 = arith.constant 0 : index
      %c0_26 = arith.constant 0 : index
      %63 = vector.load %arg5[%c0_25, %c0_26] : memref<8x256xf32, #tpu.memory_space<vmem>>, vector<8x256xf32>
      tpu.vector_store %arg5[%c0_25, %c0_26], %62 {strides = array<i32>} : memref<8x256xf32, #tpu.memory_space<vmem>>, vector<8x256xf32>,
    } else {
    }
    %c1_i32 = arith.constant 1 : i32
    %3 = arith.muli %arg0, %c1_i32 : i32
    %4 = arith.addi %3, %arg1 : i32
    %5 = tpu.iota {dimensions = array<i32: 0>} : vector<8x1xi32>
    %c8_i32 = arith.constant 8 : i32
    %6 = arith.muli %4, %c8_i32 : i32
    %7 = vector.broadcast %6 : i32 to vector<8x1xi32>
    %8 = arith.addi %7, %5 : vector<8x1xi32>
    %c8_i32_1 = arith.constant 8 : i32
    %9 = vector.broadcast %c8_i32_1 : i32 to vector<8x1xi32>
    %10 = arith.cmpi slt, %8, %9 : vector<8x1xi32>
    %c0 = arith.constant 0 : index
    %c0_2 = arith.constant 0 : index
    %11 = vector.load %arg2[%c0, %c0_2] : memref<8x256xf32, #tpu.memory_space<vmem>>, vector<8x256xf32>
    %cst = arith.constant 0.000000e+00 : f32
    %12 = vector.shape_cast %10 : vector<8x1xi1> to vector<8x1xi1>
    %13 = vector.broadcast %12 : vector<8x1xi1> to vector<8x256xi1>
    %14 = vector.broadcast %cst : f32 to vector<8x256xf32>
    %15 = arith.select %13, %11, %14 : vector<8x256xi1>, vector<8x256xf32>
    %16 = tpu.iota {dimensions = array<i32: 1>} : vector<1x256xi32>
    %c16_i32 = arith.constant 16 : i32
    %c0_i32_3 = arith.constant 0 : i32
    %17 = arith.cmpi eq, %c16_i32, %c0_i32_3 : i32
    %c1_i32_4 = arith.constant 1 : i32
    %18 = arith.select %17, %c1_i32_4, %c16_i32 : i32
    %19 = vector.broadcast %18 : i32 to vector<1x256xi32>
    %20 = arith.remsi %16, %19 : vector<1x256xi32>
    %c0_i32_5 = arith.constant 0 : i32
    %21 = vector.broadcast %c0_i32_5 : i32 to vector<1x256xi32>
    %22 = arith.cmpi ne, %20, %21 : vector<1x256xi32>
    %c0_i32_6 = arith.constant 0 : i32
    %23 = vector.broadcast %c0_i32_6 : i32 to vector<1x256xi32>
    %24 = arith.cmpi slt, %20, %23 : vector<1x256xi32>
    %c0_i32_7 = arith.constant 0 : i32
    %25 = arith.cmpi slt, %18, %c0_i32_7 : i32
    %26 = vector.broadcast %25 : i1 to vector<1x256xi1>
    %27 = vector.broadcast %26 : vector<1x256xi1> to vector<1x256xi1>
    %28 = arith.xori %24, %27 : vector<1x256xi1>
    %29 = arith.andi %28, %22 : vector<1x256xi1>
    %30 = vector.broadcast %18 : i32 to vector<1x256xi32>
    %31 = arith.addi %20, %30 : vector<1x256xi32>
    %32 = arith.select %29, %31, %20 : vector<1x256xi1>, vector<1x256xi32>
    %c15_i32 = arith.constant 15 : i32
    %33 = vector.broadcast %c15_i32 : i32 to vector<1x256xi32>
    %34 = arith.cmpi ne, %32, %33 : vector<1x256xi32>
    %c240_i32 = arith.constant 240 : i32
    %35 = vector.broadcast %c240_i32 : i32 to vector<1x256xi32>
    %36 = arith.cmpi slt, %16, %35 : vector<1x256xi32>
    %c255_i32 = arith.constant 255 : i32
    %37 = tpu.dynamic_rotate %15 by %c255_i32 dim 1 : vector<8x256xf32>, i32 -> vector<8x256xf32>
    %c240_i32_8 = arith.constant 240 : i32
    %38 = tpu.dynamic_rotate %15 by %c240_i32_8 dim 1 : vector<8x256xf32>, i32 -> vector<8x256xf32>
    %39 = arith.subf %37, %15 : vector<8x256xf32>
    %cst_9 = arith.constant 0.000000e+00 : f32
    %40 = vector.shape_cast %34 : vector<1x256xi1> to vector<1x256xi1>
    %41 = vector.broadcast %40 : vector<1x256xi1> to vector<8x256xi1>
    %42 = vector.broadcast %cst_9 : f32 to vector<8x256xf32>
    %43 = arith.select %41, %39, %42 : vector<8x256xi1>, vector<8x256xf32>
    %44 = arith.subf %38, %15 : vector<8x256xf32>
    %cst_10 = arith.constant 0.000000e+00 : f32
    %45 = vector.shape_cast %36 : vector<1x256xi1> to vector<1x256xi1>
    %46 = vector.broadcast %45 : vector<1x256xi1> to vector<8x256xi1>
    %47 = vector.broadcast %cst_10 : f32 to vector<8x256xf32>
    %48 = arith.select %46, %44, %47 : vector<8x256xi1>, vector<8x256xf32>
    %c0_11 = arith.constant 0 : index
    %c0_12 = arith.constant 0 : index
    %49 = vector.load %arg5[%c0_11, %c0_12] : memref<8x256xf32, #tpu.memory_space<vmem>>, vector<8x256xf32>
    %50 = arith.mulf %43, %43 : vector<8x256xf32>
    %51 = arith.addf %49, %50 : vector<8x256xf32>
    %c0_13 = arith.constant 0 : index
    %c0_14 = arith.constant 0 : index
    %52 = vector.load %arg5[%c0_13, %c0_14] : memref<8x256xf32, #tpu.memory_space<vmem>>, vector<8x256xf32>
    tpu.vector_store %arg5[%c0_13, %c0_14], %51 {strides = array<i32>} : memref<8x256xf32, #tpu.memory_space<vmem>>, vector<8x256xf32>,
    %c0_15 = arith.constant 0 : index
    %c0_16 = arith.constant 0 : index
    %53 = vector.load %arg4[%c0_15, %c0_16] : memref<8x256xf32, #tpu.memory_space<vmem>>, vector<8x256xf32>
    %54 = arith.mulf %48, %48 : vector<8x256xf32>
    %55 = arith.addf %53, %54 : vector<8x256xf32>
    %c0_17 = arith.constant 0 : index
    %c0_18 = arith.constant 0 : index
    %56 = vector.load %arg4[%c0_17, %c0_18] : memref<8x256xf32, #tpu.memory_space<vmem>>, vector<8x256xf32>
    tpu.vector_store %arg4[%c0_17, %c0_18], %55 {strides = array<i32>} : memref<8x256xf32, #tpu.memory_space<vmem>>, vector<8x256xf32>,
    %c0_i32_19 = arith.constant 0 : i32
    %57 = arith.cmpi eq, %arg1, %c0_i32_19 : i32
    %58 = arith.extui %57 : i1 to i32
    %c0_i32_20 = arith.constant 0 : i32
    %59 = arith.cmpi ne, %58, %c0_i32_20 : i32
    scf.if %59 {
      %c0_21 = arith.constant 0 : index
      %c0_22 = arith.constant 0 : index
      %60 = vector.load %arg4[%c0_21, %c0_22] : memref<8x256xf32, #tpu.memory_space<vmem>>, vector<8x256xf32>
      %61 = vector.shape_cast %60 : vector<8x256xf32> to vector<1x8x256xf32>
      %cst_23 = arith.constant dense<0.000000e+00> : vector<1xf32>
      %62 = vector.multi_reduction <add>, %61, %cst_23 [1, 2] : vector<1x8x256xf32> to vector<1xf32>
      %63 = vector.shape_cast %62 : vector<1xf32> to vector<1x1x1xf32>
      %64 = vector.extract %63[0, 0, 0] : f32 from vector<1x1x1xf32>
      %65 = vector.broadcast %64 : f32 to vector<1x1xf32>
      %c0_24 = arith.constant 0 : index
      %c0_25 = arith.constant 0 : index
      %66 = vector.load %arg5[%c0_24, %c0_25] : memref<8x256xf32, #tpu.memory_space<vmem>>, vector<8x256xf32>
      %67 = vector.shape_cast %66 : vector<8x256xf32> to vector<1x8x256xf32>
      %cst_26 = arith.constant dense<0.000000e+00> : vector<1xf32>
      %68 = vector.multi_reduction <add>, %67, %cst_26 [1, 2] : vector<1x8x256xf32> to vector<1xf32>
      %69 = vector.shape_cast %68 : vector<1xf32> to vector<1x1x1xf32>
      %70 = vector.extract %69[0, 0, 0] : f32 from vector<1x1x1xf32>
      %71 = vector.broadcast %70 : f32 to vector<1x1xf32>
      %cst_27 = arith.constant 0.00104166672 : f32
      %72 = vector.broadcast %cst_27 : f32 to vector<1x1xf32>
      %73 = arith.mulf %65, %72 : vector<1x1xf32>
      %cst_28 = arith.constant 0.00104166672 : f32
      %74 = vector.broadcast %cst_28 : f32 to vector<1x1xf32>
      %75 = arith.mulf %71, %74 : vector<1x1xf32>
      %76 = arith.addf %73, %75 : vector<1x1xf32>
      %cst_29 = arith.constant 1.000000e+00 : f32
      %77 = vector.broadcast %cst_29 : f32 to vector<1x1xf32>
      %78 = arith.mulf %77, %76 : vector<1x1xf32>
      %c0_30 = arith.constant 0 : index
      %c0_31 = arith.constant 0 : index
      %c0_32 = arith.constant 0 : index
      %79 = vector.load %arg3[%c0_30, %c0_31, %c0_32] : memref<1x1x1xf32, #tpu.memory_space<vmem>>, vector<1x1x1xf32>
      %80 = vector.shape_cast %79 : vector<1x1x1xf32> to vector<1x1xf32>
      %81 = vector.shape_cast %78 : vector<1x1xf32> to vector<1x1x1xf32>
      tpu.vector_store %arg3[%c0_30, %c0_31, %c0_32], %81 {strides = array<i32>} : memref<1x1x1xf32, #tpu.memory_space<vmem>>, vector<1x1x1xf32>,
    } else {
    }
    return
  }
  func.func @transform_0(%arg0: i32, %arg1: i32) -> (i32, i32) {
    %c1_i32 = arith.constant 1 : i32
    %0 = arith.muli %arg0, %c1_i32 : i32
    %1 = arith.addi %0, %arg1 : i32
    %c0_i32 = arith.constant 0 : i32
    %2 = arith.minsi %1, %c0_i32 : i32
    %c0_i32_0 = arith.constant 0 : i32
    %c0_i32_1 = arith.constant 0 : i32
    return %2, %c0_i32_0 : i32, i32
  }
  func.func @transform_1(%arg0: i32, %arg1: i32) -> (i32, i32, i32) {
    %c0_i32 = arith.constant 0 : i32
    %c0_i32_0 = arith.constant 0 : i32
    %c0_i32_1 = arith.constant 0 : i32
    return %arg0, %c0_i32, %c0_i32_0 : i32, i32, i32
  }
}

</mosaic_0001>

<bundles_post_ra>
// kernel: tpu_custom_call.1
= control target key start
LH: loop header
LB: loop body
LE: loop exit
PB: predicated region body
PF: predicated region fallthrough
CT: control target
= control target key end

     0   :  { %6 = vsyncpa [#allocation5], 0  ;;  %s601_s0 = inlined_call_operand.hbm [shape: f32[8,256], index: 0, kind: input, shape index: {}]   ;;  %s602_s1 = inlined_call_operand.vmem [shape: f32[2,1,1], index: 1, kind: output, shape index: {}]  }
   0x1   :  { %8 = vsyncpa [#allocation5 + $0x1], 0  ;;  %s518_s6 = smov 0   ;;  %s520_s7 = smov 0  }
   0x2   :  { %s522_s8 = smov 0   ;;  %s524_s9 = smov 0  }
   0x3   :  { %s526_s10 = smov 0  }
   0x4 LB: > { %s354_s11 = sadd.s32 4294967295, %s503_s10   ;;  %s26_s12 = sadd.s32 1, %s499_s9  ;;  %s503_s10 = sphi %s526_s10, %s14_s10   ;;  %s499_s9 = sphi %s524_s9, %s611_s9   ;;  %s495_s8 = sphi %s522_s8, %s610_s8   ;;  %s491_s7 = sphi %s520_s7, %s591_s7   ;;  %s487_s6 = sphi %s518_s6, %s609_s6  }
   0x5   : > { %p28_p0 = scmp.ge.s32.totalorder %s26_s12, 2  ;;  %p484_p1 = scmp.ne.s32.totalorder %s491_s7, 0 }
   0x6   : > { %p47_p2 = scmp.eq.s32.totalorder %s503_s10, 0  ;;  %p52_p3 = scmp.ne.s32.totalorder %s491_s7, %s487_s6 }
   0x7   : > { %s613_s12 = smov (%p28_p0, %s26_s12), 0  ;;  %p53_p4 = scmp.eq.s32.totalorder %s354_s11, 0 }
   0x8   : > { %p48_p5 = por %p484_p1, %p47_p2  ;;  %p377_p7 = scmp.lt.s32.totalorder %s503_s10, 2 }
   0x9   : > { %p548_p6 = por %p53_p4, %p52_p3  ;;  %s505_s14 = smov [#allocation4]  }
   0xa   : > { %s117_s15 = sshll.u32 %s505_s14, 4  ;;  %p553_p8 = pnand %p377_p7, %p48_p5  ;;  %s118_s15 = int_to_ptr.vmem [resolvable:$true] %s117_s15 }
   0xb   : > { %s604_s13 = scalar_select %p548_p6, 1, 0 }
   0xc   : > { %s428_s19 = scalar_lea.hbm %s601_s0, 256  ;;  %p430_p12 = pneg %p553_p8 }
   0xd   : > { %p429_p11 = scmp.ne.s32.totalorder %s601_s0, %s428_s19  ;;  %p435_p1 = scmp.lt.s32.totalorder %s428_s19, %s428_s19 }
   0xf   : > { %p431_p13 = pnand %p430_p12, %p429_p11 }
  0x11   : > { %p432_p0 = pneg %p431_p13 }
  0x13   : > { %p437_p2 = pnand %p435_p1, %p432_p0 }
  0x15   : > { %440 = shalt.err (!%p437_p2)
}
  0x16   : > { %s441_s22 = scalar_lea.vmem %s118_s15, 256  ;;  %s448_s23 = scalar_lea.vmem %s118_s15, 512 }
  0x17   : > { %p442_p3 = scmp.ne.s32.totalorder %s118_s15, %s441_s22  ;;  %p449_p7 = scmp.lt.s32.totalorder %s118_s15, %s118_s15 }
  0x18   : > { %p450_p9 = scmp.lt.s32.totalorder %s448_s23, %s441_s22 }
  0x19   : > { %p444_p4 = pnand %p442_p3, %p430_p12 }
  0x1a   : > { %p451_p10 = por %p450_p9, %p449_p7 }
  0x1b   : > { %p445_p5 = pneg %p444_p4 }
  0x1d   : > { %p452_p6 = pnand %p451_p10, %p445_p5 }
  0x1f   : > { %455 = shalt.err (!%p452_p6)
}
  0x20   : > { %376 = dma.hbm_to_vmem [thread:$0]  (!%p553_p8), %s601_s0, 256, %s118_s15, [#allocation5]  }
  0x21   : > { %p606_p11 = scmp.lt.s32.totalorder %s503_s10, 3  ;;  %p607_p13 = scmp.ge.s32.totalorder %s503_s10, 1 }
  0x23   : > { %p123_p0 = pnand %p607_p13, %p606_p11 }
  0x24   : > { %s128_s26 = sand.u32 (!%p123_p0), 1, %s491_s7   ;;  %p608_p9 = scmp.ne.s32.totalorder (!%p123_p0), %s604_s13, 0 }
  0x25   : > { %126 = sbr.rel (%p123_p0) target bundleno = 385 (0x181), region = 24  ;;  %s362_s27 = sshll.u32 (!%p123_p0), %s128_s26, 4 }
  0x26   : > { %s129_s28 = scalar_lea.sflag (!%p123_p0), [#allocation5], %s128_s26  ;;  %s132_s29 = scalar_lea.vmem (!%p123_p0), [#allocation4], %s362_s27 }
  0x2a   : > { %481 = dma.done.wait (%p608_p9), %s129_s28, 256  }
  0x2b   : > { %483 = vsyncadd (%p608_p9), %s129_s28, 4294967040  ;;  %v164_v0 = vlaneseq  ;;  %s363_s30 = sshll.u32 %s495_s8, 3  ;;  %v170_v4 = vld [vmem:[%s132_s29] sm:$0xff]  ;;  %v171_v5 = vld [vmem:[%s132_s29 + $0x8] sm:$0xff]  ;;  %s506_s2 = smov 112   ;;  %vm285_vm6 = vcmask 0  }
  0x2c   : > { %v167_v1 = vstv %s363_s30  ;;  %s507_s3 = smov 127   ;;  %p152_p6 = scmp.lt.s32.totalorder %s495_s8, 1 }
  0x2d   : > { %v165_v2 = vshrl.u32 %v164_v0, 7  ;;  %v177_v8 = vand.u32 127, %v164_v0 }
  0x2e   : > { %s615_s8 = smov (!%p152_p6, %s495_s8), 1 }
  0x2f   : > { %v168_v3 = vadd.s32 %v167_v1, %v165_v2  ;;  %v178_v9 = vadd.s32 128, %v177_v8  ;;  %v183_v12 = vand.u32 15, %v177_v8  ;;  %vm218_vm1 = vcmp.lt.s32.totalorder %v177_v8, 112  ;;  %s154_s13 = scalar_lea.vmem %s602_s1, %s615_s8 }
  0x30   : > { %vm211_vm2 = vcmp.lt.s32.totalorder %v177_v8, 127 }
  0x31   : > { %vm169_vm0 = vcmp.lt.s32.totalorder %v168_v3, 8  ;;  %v190_v13 = vand.u32 15, %v178_v9  ;;  %vm206_vm3 = vcmp.lt.s32.totalorder %v178_v9, 240  ;;  %vm203_vm4 = vcmp.ne.s32.totalorder %v183_v12, 15 }
  0x32   : > { %v174_v6 = vsel %vm169_vm0, %v170_v4, 0.0  ;;  %v175_v7 = vsel %vm169_vm0, %v171_v5, 0.0 }
  0x33   : > { %214 = vrot.lane.b32.xlu1 %v174_v6, %s506_s2  ;;  %207 = vrot.lane.b32.xlu0 %v174_v6, %s507_s3  ;;  %vm204_vm5 = vcmp.ne.s32.totalorder %v190_v13, 15 }
  0x37   : > { %216 = vrot.lane.b32.xlu1 %v175_v7, %s506_s2  ;;  %209 = vrot.lane.b32.xlu0 %v175_v7, %s507_s3 }
  0xa5   : > { %v215_v10 = vpop.permute.xlu1 %214  ;;  %v208_v11 = vpop.permute.xlu0 %207 }
  0xa9   : > { %v217_v14 = vpop.permute.xlu1 %216  ;;  %v210_v15 = vpop.permute.xlu0 %209 }
  0xaa   : > { %v219_v16 = vsel %vm218_vm1, %v215_v10, %v217_v14  ;;  %v220_v17 = vsel %vm218_vm1, %v217_v14, %v215_v10  ;;  %v212_v18 = vsel %vm211_vm2, %v208_v11, %v210_v15  ;;  %v213_v19 = vsel %vm211_vm2, %v210_v15, %v208_v11 }
  0xab   : > { %v229_v20 = vsub.f32 %v219_v16, %v174_v6  ;;  %v230_v21 = vsub.f32 %v220_v17, %v175_v7  ;;  %v221_v22 = vsub.f32 %v212_v18, %v174_v6  ;;  %v222_v23 = vsub.f32 %v213_v19, %v175_v7 }
  0xad   : > { %v247_v24 = vmul.f32 %v229_v20, %v229_v20  ;;  %v236_v25 = vsel %vm206_vm3, %v230_v21, 0.0  ;;  %v227_v26 = vsel %vm203_vm4, %v221_v22, 0.0  ;;  %v228_v27 = vsel %vm204_vm5, %v222_v23, 0.0 }
  0xae   : > { %v248_v28 = vmul.f32 %v236_v25, %v236_v25  ;;  %v239_v29 = vmul.f32 %v227_v26, %v227_v26  ;;  %v240_v30 = vmul.f32 %v228_v27, %v228_v27 }
  0xb0   : > { %v258_v31 = vadd.f32 %v248_v28, %v247_v24  ;;  %v271_v32 = vadd.f32 %v240_v30, %v239_v29 }
  0xb2   : > { %259 = vadd.xlane.f32.xlu0 %v258_v31  ;;  %272 = vadd.xlane.f32.xlu1 %v271_v32 }
 0x13b   : > { %v273_v33 = vpop.xlane.xlu1 %272  ;;  %v260_v34 = vpop.xlane.xlu0 %259 }
 0x13c   : > { %v274_v35 = vrot.slane %v273_v33, 4  ;;  %v261_v36 = vrot.slane %v260_v34, 4 }
 0x13e   : > { %v275_v37 = vadd.f32 %v274_v35, %v273_v33  ;;  %v262_v38 = vadd.f32 %v261_v36, %v260_v34 }
 0x140   : > { %v276_v39 = vrot.slane %v275_v37, 2  ;;  %v263_v40 = vrot.slane %v262_v38, 2 }
 0x142   : > { %v277_v41 = vadd.f32 %v276_v39, %v275_v37  ;;  %v264_v42 = vadd.f32 %v263_v40, %v262_v38 }
 0x144   : > { %v265_v43 = vrot.slane %v264_v42, 1  ;;  %v278_v44 = vrot.slane %v277_v41, 1 }
 0x146   : > { %v266_v45 = vadd.f32 %v265_v43, %v264_v42  ;;  %v279_v46 = vadd.f32 %v278_v44, %v277_v41 }
 0x148   : > { %367 = vpush %v266_v45 }
 0x149   : > { %369 = vpush %v279_v46 }
 0x179   : > { %s368_s4 = spop %367 }
 0x17a   : > { %v268_v47 = vstv %s368_s4  ;;  %s370_s5 = spop %369 }
 0x17b   : > { %v282_v48 = vmul.f32 0.0010416667, %v268_v47  ;;  %v281_v49 = vstv %s370_s5 }
 0x17c   : > { %v283_v50 = vmul.f32 0.0010416667, %v281_v49 }
 0x17e   : > { %v284_v51 = vadd.f32 %v283_v50, %v282_v48 }
 0x180   : > { %286 = vst.msk [vmem:[%s154_s13] sm:$0x1] %vm285_vm6, %v284_v51 }
 0x181 PF: > { %s14_s10 = sadd.s32 1, %s503_s10   ;;  %s609_s6 = smov %s491_s7 }
 0x182   : > { %p11_p8 = scmp.ge.s32.totalorder %s14_s10, 4   ;;  %s591_s7 = smov 0  }
 0x183   : > { %s610_s8 = smov %s499_s9  ;;  %s611_s9 = smov %s613_s12 }
 0x184   :  { %13 = sbr.rel (!%p11_p8) target bundleno = 4 (0x4), region = 72 }
 0x189   :  { %304 = vsyncpa [#allocation5], 1 }
 0x18a   :  { %306 = vsyncpa [#allocation5 + $0x1], 1 }

</bundles_post_ra>
